<compile_context>
chip_gen: v6e
topology: v6e:2x2x1
jax: 0.10.0
libtpu: 0.0.40
codegen_flags: <defaults>
</compile_context>

<pallas_src>
import functools

import jax
import jax.numpy as jnp
from jax.experimental import pallas as pl
from jax.experimental.pallas import tpu as pltpu


def _round_up(x, m):
    return (x + m - 1) // m * m


def _buf_bytes(shape, dtype):
    """Padded-VMEM size of one buffer ((sublane, lane) tiling, dtype-aware)."""
    shape = tuple(int(s) for s in shape)
    if len(shape) == 0:
        shape = (1, 1)
    elif len(shape) == 1:
        shape = (1,) + shape
    itemsize = jnp.dtype(dtype).itemsize
    sub_mult = 8 * max(4 // max(itemsize, 1), 1)   # 8 f32 / 16 bf16 / 32 int8
    lead = 1
    for s in shape[:-2]:
        lead *= max(s, 1)
    sub = _round_up(max(shape[-2], 1), sub_mult)
    lane = _round_up(max(shape[-1], 1), 128)
    return lead * sub * lane * itemsize


def _vmem_capacity_bytes():
    """Physical VMEM per TensorCore; conservative 64 MiB (v7x) fallback."""
    try:
        info = pltpu.get_tpu_info()
        cap = int(getattr(info, "vmem_capacity_bytes", 0))
        if cap > 0:
            return cap
    except Exception:
        pass
    return 64 * 1024 * 1024


def _mlp_kernel(*refs, num_hidden_stack, unroll_hidden, vpu_last):
    if num_hidden_stack > 0:
        x_ref, w1_ref, b1_ref, wh_ref, bh_ref, wl_ref, bl_ref, o_ref = refs
    else:
        x_ref, w1_ref, b1_ref, wl_ref, bl_ref, o_ref = refs
        wh_ref = bh_ref = None

    cdtype = w1_ref.dtype  # MXU input dtype (bf16 or f32); accumulation is f32.

    # fc1 (feature-major): (H, D) @ (D, block_n) -> (H, block_n).  The x tile
    # is cast to the compute dtype here, not in the wrapper.
    h = jnp.dot(w1_ref[...], x_ref[...].astype(cdtype),
                preferred_element_type=jnp.float32)
    h = jnp.maximum(h + b1_ref[...], 0.0)            # b1 is (H, 1), lane-bcast

    # Hidden layers: h <- relu(Wh[i] @ h + bh[i]), all (H, block_n) f32.
    if num_hidden_stack > 0:
        def layer(i, hcur):
            z = jnp.dot(wh_ref[i], hcur.astype(cdtype),
                        preferred_element_type=jnp.float32)
            return jnp.maximum(z + bh_ref[i], 0.0)

        if unroll_hidden:
            for i in range(num_hidden_stack):
                h = layer(i, h)
        else:
            h = jax.lax.fori_loop(0, num_hidden_stack, layer, h)

    bl = bl_ref[0, 0]                                 # SMEM scalar
    if vpu_last:
        # M=1 MXU matmul is pure pipeline-fill overhead; do it on the VPU/XLU:
        # quantize h to the compute dtype (matches the row-major reference),
        # multiply by wl (H, 1) broadcast over lanes, reduce over the H axis.
        hq = h.astype(cdtype).astype(jnp.float32)
        wl = wl_ref[...].astype(jnp.float32)          # (H, 1)
        o_ref[...] = jnp.sum(hq * wl, axis=0, keepdims=True) + bl
    else:
        out = jax.lax.dot_general(
            wl_ref[...], h.astype(cdtype),
            dimension_numbers=(((0,), (0,)), ((), ())),
            preferred_element_type=jnp.float32)
        o_ref[...] = out + bl


def mlp_forward(x, params, *, block_n=None, single_buffer_weights=True):
    """Run the Net forward pass. x: (N, D) float32. Returns (N,) float32."""
    w1, b1, wh, bh, wl, bl = params
    n, d = x.shape
    hidden = int(w1.shape[0])
    num_hidden_stack = int(wh.shape[0])
    cdtype = w1.dtype

    # The batch tile is the *lane* axis -> multiple of 128.  Default is large
    # (each grid step costs ~0.35us and only moves ~block_n*D bytes), but keep
    # >= 2 grid steps when possible so the "parallel" axis can shard across
    # v7x's two TensorCores.
    if block_n is None:
        block_n = min(2048, _round_up(n, 256))
        while block_n > 128 and _round_up(n, block_n) // block_n < 2:
            block_n //= 2
    block_n = max(128, _round_up(int(block_n), 128))
    n_pad = _round_up(n, block_n)
    num_blocks = n_pad // block_n

    # Feature-major input: (D, N_pad).  x keeps its stored dtype; the compute
    # cast happens per-tile inside the kernel.
    xt = x.T
    if n_pad != n:
        xt = jnp.pad(xt, ((0, 0), (0, n_pad - n)))

    vpu_last = hidden <= 256
    kernel = functools.partial(_mlp_kernel,
                               num_hidden_stack=num_hidden_stack,
                               unroll_hidden=num_hidden_stack <= 16,
                               vpu_last=vpu_last)

    # Scoped-VMEM budget: resident weights (worst case double-buffered) +
    # double-buffered I/O tiles + live activations + headroom, capped at 85%
    # of this generation's physical VMEM.
    est = 2 * _buf_bytes((d, block_n), x.dtype)              # x tile (2 bufs)
    est += 2 * _buf_bytes((1, block_n), jnp.float32)         # out tile (2 bufs)
    weight_bufs = [(w1.shape, cdtype), (b1.shape, b1.dtype), (wl.shape, cdtype)]
    if num_hidden_stack > 0:
        weight_bufs += [(wh.shape, cdtype), (bh.shape, bh.dtype)]
    est += 2 * sum(_buf_bytes(s, dt) for s, dt in weight_bufs)
    est += 4 * _buf_bytes((hidden, block_n), jnp.float32)    # activations/temps
    vmem_limit = min(int(0.85 * _vmem_capacity_bytes()),
                     est + 16 * 1024 * 1024)

    def _build(single_buf):
        def const_spec(shape):
            ndim = len(shape)
            imap = lambda i, _n=ndim: (0,) * _n
            if single_buf:
                # Grid-invariant operands: no re-fetch, one buffer is enough.
                return pl.BlockSpec(shape, imap, pipeline_mode=pl.Buffered(1))
            return pl.BlockSpec(shape, imap)

        in_specs = [
            pl.BlockSpec((d, block_n), lambda i: (0, i)),        # x tile (D, bn)
            const_spec((hidden, d)),                             # W1 (H, D)
            const_spec((hidden, 1)),                             # b1 (H, 1)
        ]
        args = [xt, w1, b1]
        if num_hidden_stack > 0:
            in_specs += [
                const_spec((num_hidden_stack, hidden, hidden)),  # Wh (L-1,H,H)
                const_spec((num_hidden_stack, hidden, 1)),       # bh (L-1,H,1)
            ]
            args += [wh, bh]
        in_specs += [
            const_spec((hidden, 1)),                             # Wlast (H, 1)
            pl.BlockSpec(memory_space=pltpu.MemorySpace.SMEM),   # blast scalar
        ]
        args += [wl, bl]

        return pl.pallas_call(
            kernel,
            out_shape=jax.ShapeDtypeStruct((1, n_pad), jnp.float32),
            grid_spec=pltpu.PrefetchScalarGridSpec(
                num_scalar_prefetch=0,
                grid=(num_blocks,),
                in_specs=in_specs,
                out_specs=pl.BlockSpec((1, block_n), lambda i: (0, i)),
            ),
            compiler_params=pltpu.CompilerParams(
                dimension_semantics=("parallel",),
                vmem_limit_bytes=vmem_limit,
            ),
        )(*args)

    if single_buffer_weights:
        try:
            out2d = _build(True)
        except (pltpu.LoweringException, NotImplementedError,
                TypeError, ValueError):
            # pl.Buffered(1) rejected by this jax/libtpu combo -> default
            # double buffering.  The fallback runs the identical kernel, so a
            # genuine kernel bug would still surface here.
            out2d = _build(False)
    else:
        out2d = _build(False)

    # .squeeze(1) from the PyTorch forward + drop batch padding — glue in JAX.
    return out2d[0, :n]


def init_params(key, dimension, layer, hidden, compute_dtype=jnp.bfloat16):
    """Deterministic init mirroring nn.Linear default (uniform +-1/sqrt(fan_in)).

    Feature-major storage: weights keep PyTorch's native (out_features,
    in_features) layout (so W @ h works directly on column-major activations),
    biases are (out_features, 1) columns, and the last layer's weight is stored
    as an (H, 1) column.  Weights use `compute_dtype` (bf16 default: fast MXU
    path, half the HBM/VMEM bytes); biases stay float32.
    """
    keys = jax.random.split(key, 2 * (layer + 1))

    def linear(kw, kb, fan_in, fan_out):
        bound = float(fan_in) ** -0.5
        w = jax.random.uniform(kw, (fan_out, fan_in), jnp.float32, -bound, bound)
        b = jax.random.uniform(kb, (fan_out, 1), jnp.float32, -bound, bound)
        return w, b

    w1, b1 = linear(keys[0], keys[1], dimension, hidden)        # (H, D), (H, 1)

    wh_list, bh_list = [], []
    for i in range(layer - 1):
        w, b = linear(keys[2 + 2 * i], keys[3 + 2 * i], hidden, hidden)
        wh_list.append(w)
        bh_list.append(b)
    if layer - 1 > 0:
        wh = jnp.stack(wh_list, axis=0)            # (L-1, H, H)
        bh = jnp.stack(bh_list, axis=0)            # (L-1, H, 1)
    else:
        wh = jnp.zeros((0, hidden, hidden), jnp.float32)
        bh = jnp.zeros((0, hidden, 1), jnp.float32)

    wlast, blast = linear(keys[-2], keys[-1], hidden, 1)   # (1, H), (1, 1)
    wl = wlast.T                                           # (H, 1)

    return (w1.astype(compute_dtype), b1,
            wh.astype(compute_dtype), bh,
            wl.astype(compute_dtype), blast)


def reference_forward(x, params):
    """Pure-JAX row-major reference with the same dtypes/quantization."""
    w1, b1, wh, bh, wl, bl = params
    cdtype = w1.dtype
    prec = jax.lax.Precision.HIGHEST
    h = jnp.dot(x.astype(cdtype), w1.T,
                preferred_element_type=jnp.float32, precision=prec) + b1[:, 0]
    h = jnp.maximum(h, 0.0)
    for i in range(wh.shape[0]):
        h = jnp.dot(h.astype(cdtype), wh[i].T,
                    preferred_element_type=jnp.float32, precision=prec) + bh[i, :, 0]
        h = jnp.maximum(h, 0.0)
    out = jnp.dot(h.astype(cdtype), wl,
                  preferred_element_type=jnp.float32, precision=prec) + bl[0, 0]
    return out[:, 0]


if __name__ == "__main__":
    # Shapes consistent with Net(dimension, layer, hidden). N is ragged on
    # purpose: block_n auto-selects 1024, x pads 2000 -> 2048, giving a 2-step
    # "parallel" grid (one step per v7x TensorCore).
    dimension, layer, hidden = 4, 3, 32
    N = 2000

    key = jax.random.PRNGKey(0)
    kx, kp = jax.random.split(key)
    x = jax.random.normal(kx, (N, dimension), dtype=jnp.float32)

    # 1) bf16 weights / f32 accumulation (the v6e/v7x fast path).
    params_bf16 = init_params(kp, dimension, layer, hidden,
                              compute_dtype=jnp.bfloat16)
    out = jax.block_until_ready(mlp_forward(x, params_bf16))
    ref = reference_forward(x, params_bf16)
    assert out.shape == (N,)
    assert jnp.allclose(out, ref, atol=1e-3, rtol=1e-3), \
        float(jnp.max(jnp.abs(out - ref)))

    # 2) Full-f32 run: tight check of the kernel arithmetic itself.
    params_f32 = init_params(kp, dimension, layer, hidden,
                             compute_dtype=jnp.float32)
    out32 = jax.block_until_ready(mlp_forward(x, params_f32))
    ref32 = reference_forward(x, params_f32)
    assert jnp.allclose(out32, ref32, atol=1e-4, rtol=1e-4), \
        float(jnp.max(jnp.abs(out32 - ref32)))

    # 3) layer == 1 edge case (empty hidden stack): wh/bh operands are skipped,
    #    so there is no zero-extent BlockSpec.
    params_l1 = init_params(kp, dimension, 1, hidden,
                            compute_dtype=jnp.bfloat16)
    x1 = x[:500]
    out1 = jax.block_until_ready(mlp_forward(x1, params_l1))
    ref1 = reference_forward(x1, params_l1)
    assert out1.shape == (500,)
    assert jnp.allclose(out1, ref1, atol=1e-3, rtol=1e-3), \
        float(jnp.max(jnp.abs(out1 - ref1)))

    print("KERNEL_OK")
</pallas_src>

<mosaic_0001>
module attributes {stable_mosaic.version = 11 : i64} {
  func.func @_mlp_kernel(%arg0: i32, %arg1: memref<4x1024xf32, #tpu.memory_space<vmem>>, %arg2: memref<32x4xbf16, #tpu.memory_space<vmem>>, %arg3: memref<32x1xf32, #tpu.memory_space<vmem>>, %arg4: memref<2x32x32xbf16, #tpu.memory_space<vmem>>, %arg5: memref<2x32x1xf32, #tpu.memory_space<vmem>>, %arg6: memref<32x1xbf16, #tpu.memory_space<vmem>>, %arg7: memref<1x1xf32, #tpu.memory_space<smem>>, %arg8: memref<1x1024xf32, #tpu.memory_space<vmem>>) attributes {dimension_semantics = [#tpu.dimension_semantics<parallel>], iteration_bounds = array<i64: 2>, scalar_prefetch = 0 : i64, scratch_operands = 0 : i64, tpu.core_type = #tpu.core_type<tc>, window_params = [{transform_indices = @transform_0, window_bounds = array<i64: 4, 1024>}, {pipeline_mode = #tpu.pipeline_mode<synchronous>, transform_indices = @transform_1, window_bounds = array<i64: 32, 4>}, {pipeline_mode = #tpu.pipeline_mode<synchronous>, transform_indices = @transform_2, window_bounds = array<i64: 32, 1>}, {pipeline_mode = #tpu.pipeline_mode<synchronous>, transform_indices = @transform_3, window_bounds = array<i64: 2, 32, 32>}, {pipeline_mode = #tpu.pipeline_mode<synchronous>, transform_indices = @transform_4, window_bounds = array<i64: 2, 32, 1>}, {pipeline_mode = #tpu.pipeline_mode<synchronous>, transform_indices = @transform_5, window_bounds = array<i64: 32, 1>}, {transform_indices = @transform_6, window_bounds = array<i64: 1, 1>}, {transform_indices = @transform_7, window_bounds = array<i64: 1, 1024>}]} {
    %c0 = arith.constant 0 : index
    %c0_0 = arith.constant 0 : index
    %0 = vector.load %arg2[%c0, %c0_0] : memref<32x4xbf16, #tpu.memory_space<vmem>>, vector<32x4xbf16>
    %c0_1 = arith.constant 0 : index
    %c0_2 = arith.constant 0 : index
    %1 = vector.load %arg1[%c0_1, %c0_2] : memref<4x1024xf32, #tpu.memory_space<vmem>>, vector<4x1024xf32>
    %2 = arith.truncf %1 : vector<4x1024xf32> to vector<4x1024xbf16>
    %cst = arith.constant dense<0.000000e+00> : vector<32x1024xf32>
    %3 = tpu.matmul %0, %2, %cst {dimension_numbers = #tpu.dot_dimension_numbers<[1], [0], [0], [1], [0, 0, 1, 1], [], []>} : vector<32x4xbf16>, vector<4x1024xbf16>, vector<32x1024xf32> -> vector<32x1024xf32>
    %c0_3 = arith.constant 0 : index
    %c0_4 = arith.constant 0 : index
    %4 = vector.load %arg3[%c0_3, %c0_4] : memref<32x1xf32, #tpu.memory_space<vmem>>, vector<32x1xf32>
    %5 = vector.broadcast %4 : vector<32x1xf32> to vector<32x1024xf32>
    %6 = arith.addf %3, %5 : vector<32x1024xf32>
    %cst_5 = arith.constant 0.000000e+00 : f32
    %7 = vector.broadcast %cst_5 : f32 to vector<32x1024xf32>
    %8 = arith.maximumf %6, %7 : vector<32x1024xf32>
    %c0_6 = arith.constant 0 : index
    %c0_7 = arith.constant 0 : index
    %c0_8 = arith.constant 0 : index
    %9 = vector.load %arg4[%c0_6, %c0_7, %c0_8] : memref<2x32x32xbf16, #tpu.memory_space<vmem>>, vector<1x32x32xbf16>
    %10 = vector.shape_cast %9 : vector<1x32x32xbf16> to vector<32x32xbf16>
    %11 = arith.truncf %8 : vector<32x1024xf32> to vector<32x1024xbf16>
    %cst_9 = arith.constant dense<0.000000e+00> : vector<32x1024xf32>
    %12 = tpu.matmul %10, %11, %cst_9 {dimension_numbers = #tpu.dot_dimension_numbers<[1], [0], [0], [1], [0, 0, 1, 1], [], []>} : vector<32x32xbf16>, vector<32x1024xbf16>, vector<32x1024xf32> -> vector<32x1024xf32>
    %c0_10 = arith.constant 0 : index
    %c0_11 = arith.constant 0 : index
    %c0_12 = arith.constant 0 : index
    %13 = vector.load %arg5[%c0_10, %c0_11, %c0_12] : memref<2x32x1xf32, #tpu.memory_space<vmem>>, vector<1x32x1xf32>
    %14 = vector.shape_cast %13 : vector<1x32x1xf32> to vector<32x1xf32>
    %15 = vector.broadcast %14 : vector<32x1xf32> to vector<32x1024xf32>
    %16 = arith.addf %12, %15 : vector<32x1024xf32>
    %cst_13 = arith.constant 0.000000e+00 : f32
    %17 = vector.broadcast %cst_13 : f32 to vector<32x1024xf32>
    %18 = arith.maximumf %16, %17 : vector<32x1024xf32>
    %c1 = arith.constant 1 : index
    %c0_14 = arith.constant 0 : index
    %c0_15 = arith.constant 0 : index
    %19 = vector.load %arg4[%c1, %c0_14, %c0_15] : memref<2x32x32xbf16, #tpu.memory_space<vmem>>, vector<1x32x32xbf16>
    %20 = vector.shape_cast %19 : vector<1x32x32xbf16> to vector<32x32xbf16>
    %21 = arith.truncf %18 : vector<32x1024xf32> to vector<32x1024xbf16>
    %cst_16 = arith.constant dense<0.000000e+00> : vector<32x1024xf32>
    %22 = tpu.matmul %20, %21, %cst_16 {dimension_numbers = #tpu.dot_dimension_numbers<[1], [0], [0], [1], [0, 0, 1, 1], [], []>} : vector<32x32xbf16>, vector<32x1024xbf16>, vector<32x1024xf32> -> vector<32x1024xf32>
    %c1_17 = arith.constant 1 : index
    %c0_18 = arith.constant 0 : index
    %c0_19 = arith.constant 0 : index
    %23 = vector.load %arg5[%c1_17, %c0_18, %c0_19] : memref<2x32x1xf32, #tpu.memory_space<vmem>>, vector<1x32x1xf32>
    %24 = vector.shape_cast %23 : vector<1x32x1xf32> to vector<32x1xf32>
    %25 = vector.broadcast %24 : vector<32x1xf32> to vector<32x1024xf32>
    %26 = arith.addf %22, %25 : vector<32x1024xf32>
    %cst_20 = arith.constant 0.000000e+00 : f32
    %27 = vector.broadcast %cst_20 : f32 to vector<32x1024xf32>
    %28 = arith.maximumf %26, %27 : vector<32x1024xf32>
    %c0_21 = arith.constant 0 : index
    %c0_22 = arith.constant 0 : index
    %29 = memref.load %arg7[%c0_21, %c0_22] : memref<1x1xf32, #tpu.memory_space<smem>>
    %30 = arith.truncf %28 : vector<32x1024xf32> to vector<32x1024xbf16>
    %31 = arith.extf %30 : vector<32x1024xbf16> to vector<32x1024xf32>
    %c0_23 = arith.constant 0 : index
    %c0_24 = arith.constant 0 : index
    %32 = vector.load %arg6[%c0_23, %c0_24] : memref<32x1xbf16, #tpu.memory_space<vmem>>, vector<32x1xbf16>
    %33 = arith.extf %32 : vector<32x1xbf16> to vector<32x1xf32>
    %34 = vector.broadcast %33 : vector<32x1xf32> to vector<32x1024xf32>
    %35 = arith.mulf %31, %34 : vector<32x1024xf32>
    %cst_25 = arith.constant dense<0.000000e+00> : vector<1024xf32>
    %36 = vector.multi_reduction <add>, %35, %cst_25 [0] : vector<32x1024xf32> to vector<1024xf32>
    %37 = vector.shape_cast %36 : vector<1024xf32> to vector<1x1024xf32>
    %38 = vector.broadcast %29 : f32 to vector<1x1024xf32>
    %39 = arith.addf %37, %38 : vector<1x1024xf32>
    %c0_26 = arith.constant 0 : index
    %c0_27 = arith.constant 0 : index
    %40 = vector.load %arg8[%c0_26, %c0_27] : memref<1x1024xf32, #tpu.memory_space<vmem>>, vector<1x1024xf32>
    tpu.vector_store %arg8[%c0_26, %c0_27], %39 {strides = array<i32>} : memref<1x1024xf32, #tpu.memory_space<vmem>>, vector<1x1024xf32>,
    return
  }
  func.func @transform_0(%arg0: i32) -> (i32, i32) {
    %c0_i32 = arith.constant 0 : i32
    %c0_i32_0 = arith.constant 0 : i32
    return %c0_i32, %arg0 : i32, i32
  }
  func.func @transform_1(%arg0: i32) -> (i32, i32) {
    %c0_i32 = arith.constant 0 : i32
    %c0_i32_0 = arith.constant 0 : i32
    %c0_i32_1 = arith.constant 0 : i32
    return %c0_i32, %c0_i32_0 : i32, i32
  }
  func.func @transform_2(%arg0: i32) -> (i32, i32) {
    %c0_i32 = arith.constant 0 : i32
    %c0_i32_0 = arith.constant 0 : i32
    %c0_i32_1 = arith.constant 0 : i32
    return %c0_i32, %c0_i32_0 : i32, i32
  }
  func.func @transform_3(%arg0: i32) -> (i32, i32, i32) {
    %c0_i32 = arith.constant 0 : i32
    %c0_i32_0 = arith.constant 0 : i32
    %c0_i32_1 = arith.constant 0 : i32
    %c0_i32_2 = arith.constant 0 : i32
    return %c0_i32, %c0_i32_0, %c0_i32_1 : i32, i32, i32
  }
  func.func @transform_4(%arg0: i32) -> (i32, i32, i32) {
    %c0_i32 = arith.constant 0 : i32
    %c0_i32_0 = arith.constant 0 : i32
    %c0_i32_1 = arith.constant 0 : i32
    %c0_i32_2 = arith.constant 0 : i32
    return %c0_i32, %c0_i32_0, %c0_i32_1 : i32, i32, i32
  }
  func.func @transform_5(%arg0: i32) -> (i32, i32) {
    %c0_i32 = arith.constant 0 : i32
    %c0_i32_0 = arith.constant 0 : i32
    %c0_i32_1 = arith.constant 0 : i32
    return %c0_i32, %c0_i32_0 : i32, i32
  }
  func.func @transform_6(%arg0: i32) -> (i32, i32) {
    %c0_i32 = arith.constant 0 : i32
    %c0_i32_0 = arith.constant 0 : i32
    %c0_i32_1 = arith.constant 0 : i32
    return %c0_i32, %c0_i32_0 : i32, i32
  }
  func.func @transform_7(%arg0: i32) -> (i32, i32) {
    %c0_i32 = arith.constant 0 : i32
    %c0_i32_0 = arith.constant 0 : i32
    return %c0_i32, %arg0 : i32, i32
  }
}

</mosaic_0001>

<bundles_post_ra>
// kernel: tpu_custom_call.1
= control target key start
LH: loop header
LB: loop body
LE: loop exit
PB: predicated region body
PF: predicated region fallthrough
CT: control target
= control target key end

     0   :  { %s2187_s0 = inlined_call_operand.vmem [shape: f32[4,2048], index: 0, kind: input, shape index: {}]   ;;  %s2188_s1 = inlined_call_operand.vmem [shape: bf16[32,4], index: 1, kind: input, shape index: {}]   ;;  %s2189_s2 = inlined_call_operand.vmem [shape: f32[32,1], index: 2, kind: input, shape index: {}]   ;;  %s2190_s3 = inlined_call_operand.vmem [shape: bf16[2,32,32], index: 3, kind: input, shape index: {}]   ;;  %s2191_s4 = inlined_call_operand.vmem [shape: f32[2,32,1], index: 4, kind: input, shape index: {}]   ;;  %s2192_s5 = inlined_call_operand.vmem [shape: bf16[32,1], index: 5, kind: input, shape index: {}]   ;;  %s2193_s6 = inlined_call_operand.<no memory space> [shape: f32[1,1], index: 6, kind: input, shape index: {}]   ;;  %s2194_s7 = inlined_call_operand.hbm [shape: f32[1,2048], index: 7, kind: output, shape index: {}]  }
   0x1   :  { %12 = sst [smem:[#allocation2]] %s2193_s6 }
   0x2   :  { %13 = vsyncpa [#allocation4], 0 }
   0x3   :  { %15 = vsyncpa [#allocation4 + $0x1], 0  ;;  %s1784_s26 = smov 0   ;;  %s1786_s27 = smov 0  }
   0x4   :  { %s1788_s28 = smov 0   ;;  %s1790_s29 = smov 0  }
   0x5 LB: > { %s1805_s6 = sadd.s32 4294967295, %s1736_s29   ;;  %s1554_s30 = sadd.s32 4294967294, %s1736_s29   ;;  %s1736_s29 = sphi %s1790_s29, %s2200_s29   ;;  %s1732_s28 = sphi %s1788_s28, %s2199_s28   ;;  %s1728_s27 = sphi %s1786_s27, %s2198_s27   ;;  %s1724_s26 = sphi %s1784_s26, %s2197_s26  }
   0x6   : > { %s1809_s8 = sadd.s32 1, %s1736_s29   ;;  %s180_s9 = sadd.s32 1, %s1732_s28 }
   0x7   : > { %s177_s10 = ssub.s32 %s1736_s29, %s1809_s8  ;;  %p190_p0 = scmp.ne.s32.totalorder %s1732_s28, %s1728_s27 }
   0x8   : > { %p178_p1 = scmp.eq.s32.totalorder %s177_s10, 0  ;;  %p191_p2 = scmp.eq.s32.totalorder %s1805_s6, 1 }
   0x9   : > { %p196_p3 = scmp.ne.s32.totalorder %s1728_s27, %s1724_s26  ;;  %p197_p4 = scmp.eq.s32.totalorder %s1554_s30, 1 }
   0xa   : > { %s1820_s11 = scalar_select %p178_p1, %s1732_s28, %s180_s9  }
   0xb   : > { %p1822_p5 = por %p191_p2, %p190_p0  ;;  %p1826_p6 = por %p197_p4, %p196_p3 }
   0xc   : > { %p1557_p7 = scmp.ge.s32.totalorder %s1736_s29, 1  ;;  %p242_p8 = scmp.lt.s32.totalorder %s1736_s29, 3 }
   0xe   : > { %p243_p9 = pnand %p1557_p7, %p242_p8 }
   0xf   : > { %s1559_s14 = sshll.u32 (!%p243_p9), %s1805_s6, 3  ;;  %s271_s15 = sand.u32 (!%p243_p9), 1, %s1728_s27  }
  0x10   : > { %246 = sbr.rel (%p243_p9) target bundleno = 759 (0x2f7), region = 48  ;;  %p275_p10 = scmp.lt.s32.totalorder (!%p243_p9), %s1559_s14, 15 }
  0x11   : > { %s1558_s16 = sshll.u32 (!%p243_p9), %s271_s15, 3  ;;  %s1608_s17 = sshll.u32 (!%p243_p9), %s1805_s6, 7 }
  0x12   : > { %s273_s18 = scalar_lea.vmem (!%p243_p9), [#allocation3], %s1558_s16  ;;  %s1493_s22 = scalar_lea.hbm (!%p243_p9), %s2194_s7, %s1608_s17 }
  0x13   : > { %s1495_s19 = sshll.u32 (!%p243_p9), %s273_s18, 4  ;;  %s1481_s23 = scalar_lea.sflag (!%p243_p9), [#allocation4], %s271_s15  ;;  %s1496_s19 = int_to_ptr.vmem [resolvable:$true] %s1495_s19 }
  0x14   : > { %s1676_s24 = scalar_lea.vmem (!%p243_p9), %s1496_s19, 128  ;;  %s1740_s25 = smov (!%p243_p9), [#allocation3]  }
  0x15   : > { %v1738_v0 = vmov 0   ;;  %v312_v1 = vld [vmem:[%s2189_s2 + $0x10] sm:$0xff]  ;;  %s2202_s14 = smov (!%p275_p10, %s1559_s14), 15  ;;  %v310_v2 = vld [vmem:[%s2189_s2] sm:$0xff]  ;;  %v313_v3 = vld [vmem:[%s2189_s2 + $0x18] sm:$0xff]  ;;  %vm351_vm0 = vcmask 1041408   ;;  %p1677_p11 = scmp.ne.s32.totalorder %s1496_s19, %s1676_s24 }
  0x16   : > { %408 = vmatprep.mubr.bf16.mxu0 %v1738_v0  ;;  %461 = vmatprep.mubr.bf16.mxu1 %v1738_v0  ;;  %s1560_s21 = sshll.u32 %s2202_s14, 2  ;;  %v311_v4 = vld [vmem:[%s2189_s2 + $0x8] sm:$0xff]  ;;  %v642_v13 = vld [vmem:[%s2191_s4 + $0x10] sm:$0xff]  ;;  %v1668_v24 = vld [vmem:[%s2188_s1] sm:$0xff]   ;;  %vm344_vm1 = vcmask 31744   ;;  %vm674_vm2 = vcmask 261120  }
  0x17   : > { %1659 = vset.pattern.permute.xlu0 %v1738_v0  ;;  %1660 = vset.pattern.permute.xlu1 %v1738_v0  ;;  %s278_s30 = scalar_lea.vmem %s2187_s0, %s1560_s21  ;;  %v640_v25 = vld [vmem:[%s2191_s4] sm:$0xff]  ;;  %v643_v26 = vld [vmem:[%s2191_s4 + $0x18] sm:$0xff]  ;;  %v641_v30 = vld [vmem:[%s2191_s4 + $0x8] sm:$0xff]  ;;  %s2136_s14 = sld [smem:[#allocation2]] }
  0x18   : > { %326 = vperm.xlu0 %1659, %v312_v1   ;;  %316 = vperm.xlu1 %1660, %v310_v2   ;;  %v286_v5 = vld [vmem:[%s278_s30] sm:$0xff]  ;;  %v287_v6 = vld [vmem:[%s278_s30 + $0x8] sm:$0xff]  ;;  %v288_v7 = vld [vmem:[%s278_s30 + $0x10] sm:$0xff]  ;;  %p1678_p12 = pnand %p1677_p11, %p1822_p5 }
  0x19   : > { %v294_v8 = vcombine.high %v286_v5, %v286_v5  ;;  %v295_v9 = vcombine.high %v287_v6, %v287_v6  ;;  %v302_v10 = vpack.c.bf16 %v286_v5, %v286_v5  ;;  %v304_v11 = vpack.c.bf16 %v287_v6, %v287_v6  ;;  %v289_v12 = vld [vmem:[%s278_s30 + $0x18] sm:$0xff]  ;;  %v1589_v29 = vld [vmem:[%s2191_s4 + $0x20] sm:$0xff]  ;;  %v1669_v34 = vld [vmem:[%s2188_s1 + $0x8] sm:$0xff]   ;;  %s1680_s30 = sshll.u32 %s1740_s25, 4  ;;  %s1681_s30 = int_to_ptr.vmem [resolvable:$false] %s1680_s30 }
  0x1a   : > { %v296_v14 = vcombine.high %v288_v7, %v288_v7  ;;  %v297_v15 = vcombine.high %v289_v12, %v289_v12  ;;  %v306_v22 = vpack.c.bf16 %v288_v7, %v288_v7  ;;  %v308_v23 = vpack.c.bf16 %v289_v12, %v289_v12  ;;  %v1610_v31 = vld [vmem:[%s2192_s5] sm:$0xff]   ;;  %v1591_v35 = vld [vmem:[%s2191_s4 + $0x30] sm:$0xff]  ;;  %v1590_v36 = vld [vmem:[%s2191_s4 + $0x28] sm:$0xff]  ;;  %p1679_p13 = pneg %p1678_p12  ;;  %s1682_s6 = scalar_lea.vmem %s1681_s30, 256 }
  0x1b   : > { %v303_v16 = vpack.c.bf16 %v294_v8, %v294_v8  ;;  %v305_v17 = vpack.c.bf16 %v295_v9, %v295_v9  ;;  %v353_v18 = vsel %vm351_vm0, %v302_v10, 0  ;;  %v359_v19 = vsel %vm351_vm0, %v304_v11, 0  ;;  %v1617_v38 = vld [vmem:[%s2192_s5 + $0x8] sm:$0xff]   ;;  %v1592_v39 = vld [vmem:[%s2191_s4 + $0x38] sm:$0xff]  ;;  %p1683_p0 = scmp.lt.s32.totalorder %s1496_s19, %s1681_s30  ;;  %p1684_p1 = scmp.lt.s32.totalorder %s1682_s6, %s1676_s24 }
  0x1c   : > { %331 = vperm.xlu0 %1659, %v313_v3   ;;  %321 = vperm.xlu1 %1660, %v311_v4   ;;  %v307_v20 = vpack.c.bf16 %v296_v14, %v296_v14  ;;  %v309_v21 = vpack.c.bf16 %v297_v15, %v297_v15  ;;  %v365_v27 = vsel %vm351_vm0, %v306_v22, 0  ;;  %v371_v28 = vsel %vm351_vm0, %v308_v23, 0 }
  0x1d   : > { %1563 = vmatprep.subr.msk.bf16.mxu0 %vm351_vm0, %v303_v16  ;;  %1566 = vmatprep.subr.msk.bf16.mxu1 %vm351_vm0, %v305_v17  ;;  %v1611_v32 = vunpack.c.l.bf16 %v1610_v31  ;;  %v1612_v33 = vunpack.c.h.bf16 %v1610_v31  ;;  %v1616_v40 = vunpack.c.h.bf16 %v1617_v38  ;;  %v1615_v41 = vunpack.c.l.bf16 %v1617_v38  ;;  %p1685_p2 = por %p1684_p1, %p1683_p0 }
  0x1e   : > { %391 = vmatpush1.bf16.msra.mxu0 %v353_v18  ;;  %444 = vmatpush1.bf16.msra.mxu1 %v359_v19 }
  0x1f   : > { %1569 = vmatprep.subr.msk.bf16.mxu0 %vm351_vm0, %v307_v20  ;;  %1572 = vmatprep.subr.msk.bf16.mxu1 %vm351_vm0, %v309_v21  ;;  %v1661_v37 = vpack.i.bf16 %v1612_v33, %v1611_v32  ;;  %p1686_p3 = pnand %p1685_p2, %p1679_p13 }
  0x20   : > { %656 = vperm.xlu0 %1659, %v642_v13   ;;  %661 = vperm.xlu1 %1660, %v643_v26  }
  0x21   : > { %1564 = vmatmul.mubr.msk.bf16.vlgmr.msra.gmra.mxu0 %vm344_vm1, %v1668_v24  ;;  %1567 = vmatmul.mubr.msk.bf16.vlgmr.msra.gmra.mxu1 %vm344_vm1, %v1668_v24 }
  0x22   : > { %418 = vmatprep.mubr.bf16.mxu0 %v1738_v0  ;;  %471 = vmatprep.mubr.bf16.mxu1 %v1738_v0 }
  0x23   : > { %497 = vmatpush1.bf16.msra.mxu0 %v365_v27  ;;  %550 = vmatpush1.bf16.msra.mxu1 %v371_v28 }
  0x24   : > { %646 = vperm.xlu0 %1659, %v640_v25   ;;  %651 = vperm.xlu1 %1660, %v641_v30  }
  0x28   : > { %953 = vperm.xlu0 %1659, %v1589_v29   ;;  %958 = vperm.xlu1 %1660, %v1590_v36  }
  0x29   : > { %1565 = vmatmul.mubr.msk.bf16.gmra.mxu0 %vm344_vm1, %v1669_v34  ;;  %1568 = vmatmul.mubr.msk.bf16.gmra.mxu1 %vm344_vm1, %v1669_v34 }
  0x2a   : > { %514 = vmatprep.mubr.bf16.mxu0 %v1738_v0  ;;  %567 = vmatprep.mubr.bf16.mxu1 %v1738_v0 }
  0x2c   : > { %963 = vperm.xlu0 %1659, %v1591_v35   ;;  %968 = vperm.xlu1 %1660, %v1592_v39  }
  0x30   : > { %1662 = vperm.xlu0 %1659, %v1661_v37   ;;  %1300 = vperm.xlu1 %1660, %v1615_v41  }
  0x31   : > { %1570 = vmatmul.mubr.msk.bf16.vlgmr.msra.gmra.mxu0 %vm344_vm1, %v1668_v24  ;;  %1573 = vmatmul.mubr.msk.bf16.vlgmr.msra.gmra.mxu1 %vm344_vm1, %v1668_v24 }
  0x32   : > { %524 = vmatprep.mubr.bf16.mxu0 %v1738_v0  ;;  %577 = vmatprep.mubr.bf16.mxu1 %v1738_v0 }
  0x34   : > { %1305 = vperm.xlu0 %1659, %v1616_v40  }
  0x39   : > { %1571 = vmatmul.mubr.msk.bf16.gmra.mxu0 %vm344_vm1, %v1669_v34  ;;  %1574 = vmatmul.mubr.msk.bf16.gmra.mxu1 %vm344_vm1, %v1669_v34 }
  0x3a   : > { %713 = vmatprep.mubr.bf16.mxu0 %v1738_v0  ;;  %766 = vmatprep.mubr.bf16.mxu1 %v1738_v0 }
  0x93   : > { %v1912_v48 = vpop.permute.xlu0 %326  ;;  %v1914_v49 = vpop.permute.xlu1 %316 }
  0x97   : > { %v1916_v56 = vpop.permute.xlu0 %331  ;;  %v1918_v57 = vpop.permute.xlu1 %321 }
  0xe1   : > { %v410_v42 = vpop.f32.mrf.mxu0  ;;  %v463_v43 = vpop.f32.mrf.mxu1 }
  0xe2   : > { %v411_v23 = vadd.f32 %v410_v42, %v1914_v49  ;;  %v464_v24 = vadd.f32 %v463_v43, %v1914_v49 }
  0xe3   : > { %v412_v44 = vpop.f32.mrf.mxu0  ;;  %v465_v45 = vpop.f32.mrf.mxu1 }
  0xe4   : > { %v413_v3 = vadd.f32 %v412_v44, %v1914_v49  ;;  %v466_v4 = vadd.f32 %v465_v45, %v1914_v49  ;;  %v588_v41 = vmax.f32 %v411_v23, 0.0  ;;  %v590_v42 = vmax.f32 %v464_v24, 0.0 }
  0xe5   : > { %v414_v46 = vpop.f32.mrf.mxu0  ;;  %v467_v47 = vpop.f32.mrf.mxu1 }
  0xe6   : > { %v415_v9 = vadd.f32 %v414_v46, %v1918_v57  ;;  %v468_v10 = vadd.f32 %v467_v47, %v1918_v57  ;;  %v589_v29 = vmax.f32 %v413_v3, 0.0  ;;  %v591_v30 = vmax.f32 %v466_v4, 0.0 }
  0xe7   : > { %v416_v50 = vpop.f32.mrf.mxu0  ;;  %v469_v51 = vpop.f32.mrf.mxu1 }
  0xe8   : > { %v417_v58 = vadd.f32 %v416_v50, %v1918_v57  ;;  %v470_v59 = vadd.f32 %v469_v51, %v1918_v57  ;;  %v596_v33 = vmax.f32 %v415_v9, 0.0  ;;  %v598_v34 = vmax.f32 %v468_v10, 0.0  ;;  %v1943_v51 = vld [vmem:[%s2190_s3] sm:$0xff]  }
  0xe9   : > { %v420_v52 = vpop.f32.mrf.mxu0  ;;  %v473_v53 = vpop.f32.mrf.mxu1 }
  0xea   : > { %v421_v5 = vadd.f32 %v420_v52, %v1912_v48  ;;  %v474_v6 = vadd.f32 %v473_v53, %v1912_v48  ;;  %v597_v13 = vmax.f32 %v417_v58, 0.0  ;;  %v599_v14 = vmax.f32 %v470_v59, 0.0 }
  0xeb   : > { %v422_v54 = vpop.f32.mrf.mxu0  ;;  %v475_v55 = vpop.f32.mrf.mxu1  ;;  %v624_v45 = vpack.c.bf16 %v596_v33, %v588_v41  ;;  %v626_v46 = vpack.c.bf16 %v598_v34, %v590_v42 }
  0xec   : > { %v423_v62 = vadd.f32 %v422_v54, %v1912_v48  ;;  %v476_v63 = vadd.f32 %v475_v55, %v1912_v48  ;;  %v604_v25 = vmax.f32 %v421_v5, 0.0  ;;  %v606_v26 = vmax.f32 %v474_v6, 0.0 }
  0xed   : > { %v424_v60 = vpop.f32.mrf.mxu0  ;;  %v477_v61 = vpop.f32.mrf.mxu1  ;;  %v625_v39 = vpack.c.bf16 %v597_v13, %v589_v29  ;;  %v627_v40 = vpack.c.bf16 %v599_v14, %v591_v30 }
  0xee   : > { %v425_v1 = vadd.f32 %v424_v60, %v1916_v56  ;;  %v478_v2 = vadd.f32 %v477_v61, %v1916_v56  ;;  %v605_v19 = vmax.f32 %v423_v62, 0.0  ;;  %v607_v20 = vmax.f32 %v476_v63, 0.0 }
  0xef   : > { %v426_v7 = vpop.f32.mrf.mxu0  ;;  %v479_v8 = vpop.f32.mrf.mxu1 }
  0xf0   : > { %v427_v11 = vadd.f32 %v426_v7, %v1916_v56  ;;  %v480_v12 = vadd.f32 %v479_v8, %v1916_v56  ;;  %v612_v15 = vmax.f32 %v425_v1, 0.0  ;;  %v614_v16 = vmax.f32 %v478_v2, 0.0 }
  0xf1   : > { %v1934_v17 = vpop.f32.mrf.mxu0  ;;  %v1936_v18 = vpop.f32.mrf.mxu1 }
  0xf2   : > { %v613_v21 = vmax.f32 %v427_v11, 0.0  ;;  %v615_v22 = vmax.f32 %v480_v12, 0.0  ;;  %v632_v35 = vpack.c.bf16 %v612_v15, %v604_v25  ;;  %v634_v36 = vpack.c.bf16 %v614_v16, %v606_v26 }
  0xf3   : > { %v518_v27 = vpop.f32.mrf.mxu0  ;;  %v571_v28 = vpop.f32.mrf.mxu1 }
  0xf4   : > { %v633_v31 = vpack.c.bf16 %v613_v21, %v605_v19  ;;  %v635_v32 = vpack.c.bf16 %v615_v22, %v607_v20  ;;  %v519_v60 = vadd.f32 %v518_v27, %v1914_v49  ;;  %v572_v63 = vadd.f32 %v571_v28, %v1914_v49  ;;  %v1673_v19 = vld [vmem:[%s2190_s3 + $0x8] sm:$0xff]  }
  0xf5   : > { %v520_v37 = vpop.f32.mrf.mxu0  ;;  %v573_v38 = vpop.f32.mrf.mxu1 }
  0xf6   : > { %693 = vmatprep.subr.bf16.mxu0 %v633_v31  ;;  %746 = vmatprep.subr.bf16.mxu1 %v635_v32  ;;  %v521_v9 = vadd.f32 %v520_v37, %v1918_v57  ;;  %v574_v10 = vadd.f32 %v573_v38, %v1918_v57  ;;  %v593_v25 = vmax.f32 %v519_v60, 0.0  ;;  %v595_v26 = vmax.f32 %v572_v63, 0.0 }
  0xf7   : > { %v522_v43 = vpop.f32.mrf.mxu0  ;;  %v575_v44 = vpop.f32.mrf.mxu1  ;;  %694 = vmatpush1.bf16.msra.mxu0 %v632_v35  ;;  %747 = vmatpush1.bf16.msra.mxu1 %v634_v36 }
  0xf8   : > { %695 = vmatprep.subr.bf16.mxu0 %v625_v39  ;;  %748 = vmatprep.subr.bf16.mxu1 %v627_v40  ;;  %v523_v1 = vadd.f32 %v522_v43, %v1918_v57  ;;  %v576_v2 = vadd.f32 %v575_v44, %v1918_v57  ;;  %v600_v27 = vmax.f32 %v521_v9, 0.0  ;;  %v602_v28 = vmax.f32 %v574_v10, 0.0  ;;  %v1986_v40 = vpop.permute.xlu1 %661  ;;  %v1988_v43 = vpop.permute.xlu0 %656 }
  0xf9   : > { %v526_v47 = vpop.f32.mrf.mxu0  ;;  %v579_v50 = vpop.f32.mrf.mxu1 }
  0xfa   : > { %v527_v5 = vadd.f32 %v526_v47, %v1912_v48  ;;  %v580_v6 = vadd.f32 %v579_v50, %v1912_v48  ;;  %v601_v20 = vmax.f32 %v523_v1, 0.0  ;;  %v603_v21 = vmax.f32 %v576_v2, 0.0 }
  0xfb   : > { %v528_v52 = vpop.f32.mrf.mxu0  ;;  %v581_v53 = vpop.f32.mrf.mxu1  ;;  %696 = vmatpush1.bf16.msra.mxu0 %v624_v45  ;;  %749 = vmatpush1.bf16.msra.mxu1 %v626_v46 }
  0xfc   : > { %v529_v54 = vadd.f32 %v528_v52, %v1912_v48  ;;  %v582_v55 = vadd.f32 %v581_v53, %v1912_v48  ;;  %v517_v48 = vadd.f32 %v1934_v17, %v1914_v49  ;;  %v608_v22 = vmax.f32 %v527_v5, 0.0  ;;  %v1990_v50 = vpop.permute.xlu1 %651 }
  0xfd   : > { %v530_v58 = vpop.f32.mrf.mxu0  ;;  %v583_v59 = vpop.f32.mrf.mxu1  ;;  %v610_v57 = vmax.f32 %v580_v6, 0.0  ;;  %v629_v17 = vpack.c.bf16 %v601_v20, %v593_v25  ;;  %v631_v31 = vpack.c.bf16 %v603_v21, %v595_v26 }
  0xfe   : > { %v531_v61 = vadd.f32 %v530_v58, %v1916_v56  ;;  %v584_v62 = vadd.f32 %v583_v59, %v1916_v56  ;;  %1577 = vmatmul.mubr.msk.bf16.vlgmr.msra.gmra.mxu0 %vm674_vm2, %v1943_v51  ;;  %1579 = vmatmul.mubr.msk.bf16.vlgmr.msra.gmra.mxu1 %vm674_vm2, %v1943_v51  ;;  %v609_v11 = vmax.f32 %v529_v54, 0.0  ;;  %v611_v12 = vmax.f32 %v582_v55, 0.0  ;;  %v1994_v55 = vpop.permute.xlu0 %646 }
  0xff   : > { %v532_v3 = vpop.f32.mrf.mxu0  ;;  %v585_v4 = vpop.f32.mrf.mxu1  ;;  %723 = vmatprep.mubr.bf16.mxu0 %v1738_v0  ;;  %776 = vmatprep.mubr.bf16.mxu1 %v1738_v0 }
 0x100   : > { %v533_v7 = vadd.f32 %v532_v3, %v1916_v56  ;;  %v586_v8 = vadd.f32 %v585_v4, %v1916_v56  ;;  %v616_v13 = vmax.f32 %v531_v61, 0.0  ;;  %v618_v14 = vmax.f32 %v584_v62, 0.0 }
 0x101   : > { %v570_v56 = vadd.f32 %v1936_v18, %v1914_v49  ;;  %v592_v49 = vmax.f32 %v517_v48, 0.0 }
 0x102   : > { %v617_v15 = vmax.f32 %v533_v7, 0.0  ;;  %v619_v16 = vmax.f32 %v586_v8, 0.0  ;;  %v636_v29 = vpack.c.bf16 %v616_v13, %v608_v22  ;;  %v638_v30 = vpack.c.bf16 %v618_v14, %v610_v57 }
 0x103   : > { %v594_v18 = vmax.f32 %v570_v56, 0.0  ;;  %v628_v32 = vpack.c.bf16 %v600_v27, %v592_v49 }
 0x104   : > { %v637_v23 = vpack.c.bf16 %v617_v15, %v609_v11  ;;  %v639_v24 = vpack.c.bf16 %v619_v16, %v611_v12 }
 0x105   : > { %v630_v33 = vpack.c.bf16 %v602_v28, %v594_v18 }
 0x106   : > { %1578 = vmatmul.mubr.msk.bf16.gmra.mxu0 %vm674_vm2, %v1673_v19  ;;  %1580 = vmatmul.mubr.msk.bf16.gmra.mxu1 %vm674_vm2, %v1673_v19 }
 0x107   : > { %799 = vmatprep.subr.bf16.mxu0 %v637_v23  ;;  %852 = vmatprep.subr.bf16.mxu1 %v639_v24 }
 0x108   : > { %800 = vmatpush1.bf16.msra.mxu0 %v636_v29  ;;  %853 = vmatpush1.bf16.msra.mxu1 %v638_v30 }
 0x109   : > { %801 = vmatprep.subr.bf16.mxu0 %v629_v17  ;;  %854 = vmatprep.subr.bf16.mxu1 %v631_v31 }
 0x10a   : > { %819 = vmatprep.mubr.bf16.mxu0 %v1738_v0  ;;  %872 = vmatprep.mubr.bf16.mxu1 %v1738_v0 }
 0x10c   : > { %802 = vmatpush1.bf16.msra.mxu0 %v628_v32  ;;  %855 = vmatpush1.bf16.msra.mxu1 %v630_v33 }
 0x10f   : > { %1581 = vmatmul.mubr.msk.bf16.vlgmr.msra.gmra.mxu0 %vm674_vm2, %v1943_v51  ;;  %1583 = vmatmul.mubr.msk.bf16.vlgmr.msra.gmra.mxu1 %vm674_vm2, %v1943_v51 }
 0x110   : > { %829 = vmatprep.mubr.bf16.mxu0 %v1738_v0  ;;  %882 = vmatprep.mubr.bf16.mxu1 %v1738_v0 }
 0x117   : > { %1582 = vmatmul.mubr.msk.bf16.gmra.mxu0 %vm674_vm2, %v1673_v19  ;;  %1584 = vmatmul.mubr.msk.bf16.gmra.mxu1 %vm674_vm2, %v1673_v19 }
 0x118   : > { %1019 = vmatprep.mubr.bf16.mxu0 %v1738_v0  ;;  %1072 = vmatprep.mubr.bf16.mxu1 %v1738_v0 }
 0x1be   : > { %v715_v34 = vpop.f32.mrf.mxu0  ;;  %v768_v35 = vpop.f32.mrf.mxu1 }
 0x1bf   : > { %v716_v56 = vadd.f32 %v715_v34, %v1994_v55  ;;  %v769_v20 = vadd.f32 %v768_v35, %v1994_v55 }
 0x1c0   : > { %v717_v36 = vpop.f32.mrf.mxu0  ;;  %v770_v37 = vpop.f32.mrf.mxu1 }
 0x1c1   : > { %v718_v62 = vadd.f32 %v717_v36, %v1994_v55  ;;  %v771_v63 = vadd.f32 %v770_v37, %v1994_v55  ;;  %v893_v33 = vmax.f32 %v716_v56, 0.0  ;;  %v895_v34 = vmax.f32 %v769_v20, 0.0 }
 0x1c2   : > { %v719_v38 = vpop.f32.mrf.mxu0  ;;  %v772_v39 = vpop.f32.mrf.mxu1 }
 0x1c3   : > { %v720_v5 = vadd.f32 %v719_v38, %v1990_v50  ;;  %v773_v6 = vadd.f32 %v772_v39, %v1990_v50  ;;  %v894_v57 = vmax.f32 %v718_v62, 0.0  ;;  %v896_v23 = vmax.f32 %v771_v63, 0.0 }
 0x1c4   : > { %v721_v41 = vpop.f32.mrf.mxu0  ;;  %v774_v42 = vpop.f32.mrf.mxu1 }
 0x1c5   : > { %v722_v51 = vadd.f32 %v721_v41, %v1990_v50  ;;  %v775_v52 = vadd.f32 %v774_v42, %v1990_v50  ;;  %v901_v28 = vmax.f32 %v720_v5, 0.0  ;;  %v903_v29 = vmax.f32 %v773_v6, 0.0  ;;  %v2017_v42 = vld [vmem:[%s2190_s3 + $0x10] sm:$0xff]  }
 0x1c6   : > { %v725_v44 = vpop.f32.mrf.mxu0  ;;  %v778_v45 = vpop.f32.mrf.mxu1 }
 0x1c7   : > { %v726_v1 = vadd.f32 %v725_v44, %v1988_v43  ;;  %v779_v2 = vadd.f32 %v778_v45, %v1988_v43  ;;  %v902_v9 = vmax.f32 %v722_v51, 0.0  ;;  %v904_v10 = vmax.f32 %v775_v52, 0.0 }
 0x1c8   : > { %v727_v46 = vpop.f32.mrf.mxu0  ;;  %v780_v47 = vpop.f32.mrf.mxu1  ;;  %v930_v37 = vpack.c.bf16 %v901_v28, %v893_v33  ;;  %v932_v38 = vpack.c.bf16 %v903_v29, %v895_v34 }
 0x1c9   : > { %v728_v58 = vadd.f32 %v727_v46, %v1988_v43  ;;  %v781_v59 = vadd.f32 %v780_v47, %v1988_v43  ;;  %v909_v21 = vmax.f32 %v726_v1, 0.0  ;;  %v911_v22 = vmax.f32 %v779_v2, 0.0  ;;  %v2058_v29 = vpop.permute.xlu0 %953  ;;  %v2062_v33 = vpop.permute.xlu1 %958 }
 0x1ca   : > { %v729_v53 = vpop.f32.mrf.mxu0  ;;  %v782_v54 = vpop.f32.mrf.mxu1  ;;  %v931_v31 = vpack.c.bf16 %v902_v9, %v894_v57  ;;  %v933_v49 = vpack.c.bf16 %v904_v10, %v896_v23 }
 0x1cb   : > { %v730_v60 = vadd.f32 %v729_v53, %v1986_v40  ;;  %v783_v61 = vadd.f32 %v782_v54, %v1986_v40  ;;  %v910_v13 = vmax.f32 %v728_v58, 0.0  ;;  %v912_v14 = vmax.f32 %v781_v59, 0.0 }
 0x1cc   : > { %v731_v3 = vpop.f32.mrf.mxu0  ;;  %v784_v4 = vpop.f32.mrf.mxu1 }
 0x1cd   : > { %v732_v7 = vadd.f32 %v731_v3, %v1986_v40  ;;  %v785_v8 = vadd.f32 %v784_v4, %v1986_v40  ;;  %v917_v11 = vmax.f32 %v730_v60, 0.0  ;;  %v919_v12 = vmax.f32 %v783_v61, 0.0 }
 0x1cf   : > { %v918_v15 = vmax.f32 %v732_v7, 0.0  ;;  %v920_v16 = vmax.f32 %v785_v8, 0.0  ;;  %v2008_v19 = vpop.f32.mrf.mxu0  ;;  %v2010_v48 = vpop.f32.mrf.mxu1  ;;  %v938_v30 = vpack.c.bf16 %v917_v11, %v909_v21  ;;  %v940_v17 = vpack.c.bf16 %v919_v12, %v911_v22  ;;  %v1675_v11 = vld [vmem:[%s2190_s3 + $0x18] sm:$0xff]  }
 0x1d1   : > { %v939_v24 = vpack.c.bf16 %v918_v15, %v910_v13  ;;  %v941_v25 = vpack.c.bf16 %v920_v16, %v912_v14  ;;  %v823_v26 = vpop.f32.mrf.mxu0  ;;  %v876_v27 = vpop.f32.mrf.mxu1  ;;  %v822_v15 = vadd.f32 %v2008_v19, %v1994_v55 }
 0x1d2   : > { %v824_v60 = vadd.f32 %v823_v26, %v1994_v55  ;;  %v877_v61 = vadd.f32 %v876_v27, %v1994_v55 }
 0x1d3   : > { %v825_v18 = vpop.f32.mrf.mxu0  ;;  %v878_v32 = vpop.f32.mrf.mxu1  ;;  %999 = vmatprep.subr.bf16.mxu0 %v939_v24  ;;  %1052 = vmatprep.subr.bf16.mxu1 %v941_v25  ;;  %v897_v19 = vmax.f32 %v822_v15, 0.0 }
 0x1d4   : > { %1000 = vmatpush1.bf16.msra.mxu0 %v938_v30  ;;  %1053 = vmatpush1.bf16.msra.mxu1 %v940_v17  ;;  %v826_v3 = vadd.f32 %v825_v18, %v1990_v50  ;;  %v879_v4 = vadd.f32 %v878_v32, %v1990_v50  ;;  %v898_v56 = vmax.f32 %v824_v60, 0.0  ;;  %v900_v20 = vmax.f32 %v877_v61, 0.0 }
 0x1d5   : > { %v827_v35 = vpop.f32.mrf.mxu0  ;;  %v880_v36 = vpop.f32.mrf.mxu1  ;;  %1001 = vmatprep.subr.bf16.mxu0 %v931_v31  ;;  %1054 = vmatprep.subr.bf16.mxu1 %v933_v49 }
 0x1d6   : > { %v828_v46 = vadd.f32 %v827_v35, %v1990_v50  ;;  %v881_v47 = vadd.f32 %v880_v36, %v1990_v50  ;;  %v875_v50 = vadd.f32 %v2010_v48, %v1994_v55  ;;  %v905_v57 = vmax.f32 %v826_v3, 0.0  ;;  %v2064_v36 = vpop.permute.xlu0 %963 }
 0x1d7   : > { %v831_v39 = vpop.f32.mrf.mxu0  ;;  %v884_v41 = vpop.f32.mrf.mxu1  ;;  %v907_v23 = vmax.f32 %v879_v4, 0.0 }
 0x1d8   : > { %1002 = vmatpush1.bf16.msra.mxu0 %v930_v37  ;;  %1055 = vmatpush1.bf16.msra.mxu1 %v932_v38  ;;  %v832_v62 = vadd.f32 %v831_v39, %v1988_v43  ;;  %v885_v63 = vadd.f32 %v884_v41, %v1988_v43  ;;  %v906_v7 = vmax.f32 %v828_v46, 0.0  ;;  %v908_v8 = vmax.f32 %v881_v47, 0.0 }
 0x1d9   : > { %v833_v44 = vpop.f32.mrf.mxu0  ;;  %v886_v45 = vpop.f32.mrf.mxu1  ;;  %v899_v55 = vmax.f32 %v875_v50, 0.0  ;;  %v934_v48 = vpack.c.bf16 %v905_v57, %v897_v19 }
 0x1da   : > { %v834_v51 = vadd.f32 %v833_v44, %v1988_v43  ;;  %v887_v54 = vadd.f32 %v886_v45, %v1988_v43  ;;  %v913_v16 = vmax.f32 %v832_v62, 0.0  ;;  %v935_v26 = vpack.c.bf16 %v906_v7, %v898_v56  ;;  %v1663_v3 = vpop.permute.xlu0 %1662 }
 0x1db   : > { %v835_v52 = vpop.f32.mrf.mxu0  ;;  %v888_v53 = vpop.f32.mrf.mxu1  ;;  %1595 = vmatmul.mubr.msk.bf16.vlgmr.msra.gmra.mxu0 %vm674_vm2, %v2017_v42  ;;  %1597 = vmatmul.mubr.msk.bf16.vlgmr.msra.gmra.mxu1 %vm674_vm2, %v2017_v42  ;;  %v937_v27 = vpack.c.bf16 %v908_v8, %v900_v20  ;;  %v936_v28 = vpack.c.bf16 %v907_v23, %v899_v55 }
 0x1dc   : > { %v836_v58 = vadd.f32 %v835_v52, %v1986_v40  ;;  %v889_v59 = vadd.f32 %v888_v53, %v1986_v40  ;;  %1029 = vmatprep.mubr.bf16.mxu0 %v1738_v0  ;;  %1082 = vmatprep.mubr.bf16.mxu1 %v1738_v0  ;;  %v914_v12 = vmax.f32 %v834_v51, 0.0  ;;  %v916_v43 = vmax.f32 %v887_v54, 0.0 }
 0x1dd   : > { %v837_v1 = vpop.f32.mrf.mxu0  ;;  %v890_v2 = vpop.f32.mrf.mxu1 }
 0x1de   : > { %v838_v5 = vadd.f32 %v837_v1, %v1986_v40  ;;  %v891_v6 = vadd.f32 %v890_v2, %v1986_v40  ;;  %v921_v9 = vmax.f32 %v836_v58, 0.0  ;;  %v923_v10 = vmax.f32 %v889_v59, 0.0 }
 0x1df   : > { %v915_v40 = vmax.f32 %v885_v63, 0.0 }
 0x1e0   : > { %v922_v13 = vmax.f32 %v838_v5, 0.0  ;;  %v924_v14 = vmax.f32 %v891_v6, 0.0  ;;  %v942_v24 = vpack.c.bf16 %v921_v9, %v913_v16 }
 0x1e1   : > { %v944_v25 = vpack.c.bf16 %v923_v10, %v915_v40 }
 0x1e2   : > { %v943_v21 = vpack.c.bf16 %v922_v13, %v914_v12  ;;  %v945_v22 = vpack.c.bf16 %v924_v14, %v916_v43  ;;  %v2074_v13 = vunpack.i.h.bf16 %v1663_v3  ;;  %v2076_v14 = vunpack.i.l.bf16 %v1663_v3 }
 0x1e3   : > { %1596 = vmatmul.mubr.msk.bf16.gmra.mxu0 %vm674_vm2, %v1675_v11  ;;  %1598 = vmatmul.mubr.msk.bf16.gmra.mxu1 %vm674_vm2, %v1675_v11 }
 0x1e4   : > { %1105 = vmatprep.subr.bf16.mxu0 %v943_v21  ;;  %1158 = vmatprep.subr.bf16.mxu1 %v945_v22 }
 0x1e5   : > { %1106 = vmatpush1.bf16.msra.mxu0 %v942_v24  ;;  %1159 = vmatpush1.bf16.msra.mxu1 %v944_v25  ;;  %v2082_v24 = vpop.permute.xlu1 %968 }
 0x1e6   : > { %1107 = vmatprep.subr.bf16.mxu0 %v935_v26  ;;  %1160 = vmatprep.subr.bf16.mxu1 %v937_v27 }
 0x1e7   : > { %1125 = vmatprep.mubr.bf16.mxu0 %v1738_v0  ;;  %1178 = vmatprep.mubr.bf16.mxu1 %v1738_v0 }
 0x1e9   : > { %1108 = vmatpush1.bf16.msra.mxu0 %v934_v48  ;;  %1161 = vmatpush1.bf16.msra.mxu1 %v936_v28 }
 0x1ec   : > { %1599 = vmatmul.mubr.msk.bf16.vlgmr.msra.gmra.mxu0 %vm674_vm2, %v2017_v42  ;;  %1601 = vmatmul.mubr.msk.bf16.vlgmr.msra.gmra.mxu1 %vm674_vm2, %v2017_v42 }
 0x1ed   : > { %1135 = vmatprep.mubr.bf16.mxu0 %v1738_v0  ;;  %1188 = vmatprep.mubr.bf16.mxu1 %v1738_v0 }
 0x1f4   : > { %1600 = vmatmul.mubr.msk.bf16.gmra.mxu0 %vm674_vm2, %v1675_v11  ;;  %1602 = vmatmul.mubr.msk.bf16.gmra.mxu1 %vm674_vm2, %v1675_v11 }
 0x29b   : > { %v1021_v30 = vpop.f32.mrf.mxu0  ;;  %v1074_v17 = vpop.f32.mrf.mxu1 }
 0x29c   : > { %v1022_v31 = vadd.f32 %v1021_v30, %v2058_v29  ;;  %v1075_v49 = vadd.f32 %v1074_v17, %v2058_v29 }
 0x29d   : > { %v1023_v18 = vpop.f32.mrf.mxu0  ;;  %v1076_v32 = vpop.f32.mrf.mxu1 }
 0x29e   : > { %v1199_v38 = vmax.f32 %v1022_v31, 0.0  ;;  %v1201_v39 = vmax.f32 %v1075_v49, 0.0  ;;  %v1024_v41 = vadd.f32 %v1023_v18, %v2058_v29  ;;  %v1077_v42 = vadd.f32 %v1076_v32, %v2058_v29 }
 0x29f   : > { %v1025_v34 = vpop.f32.mrf.mxu0  ;;  %v1078_v35 = vpop.f32.mrf.mxu1 }
 0x2a0   : > { %v1026_v0 = vadd.f32 %v1025_v34, %v2062_v33  ;;  %v1079_v37 = vadd.f32 %v1078_v35, %v2062_v33  ;;  %v1200_v62 = vmax.f32 %v1024_v41, 0.0  ;;  %v1202_v63 = vmax.f32 %v1077_v42, 0.0 }
 0x2a1   : > { %v1027_v44 = vpop.f32.mrf.mxu0  ;;  %v1080_v45 = vpop.f32.mrf.mxu1 }
 0x2a2   : > { %v1207_v46 = vmax.f32 %v1026_v0, 0.0  ;;  %v1209_v47 = vmax.f32 %v1079_v37, 0.0  ;;  %v1028_v51 = vadd.f32 %v1027_v44, %v2062_v33  ;;  %v1081_v52 = vadd.f32 %v1080_v45, %v2062_v33 }
 0x2a3   : > { %v1031_v53 = vpop.f32.mrf.mxu0  ;;  %v1084_v54 = vpop.f32.mrf.mxu1 }
 0x2a4   : > { %v1232_v58 = vpack.c.bf16 %v1207_v46, %v1199_v38  ;;  %v1234_v59 = vpack.c.bf16 %v1209_v47, %v1201_v39  ;;  %v1208_v60 = vmax.f32 %v1028_v51, 0.0  ;;  %v1210_v61 = vmax.f32 %v1081_v52, 0.0 }
 0x2a5   : > { %v1033_v1 = vpop.f32.mrf.mxu0  ;;  %v1086_v2 = vpop.f32.mrf.mxu1  ;;  %v1032_v10 = vadd.f32 %v1031_v53, %v2064_v36  ;;  %v1085_v11 = vadd.f32 %v1084_v54, %v2064_v36 }
 0x2a6   : > { %v1248_v4 = vunpack.c.l.bf16 %v1232_v58  ;;  %v1256_v5 = vunpack.c.h.bf16 %v1232_v58  ;;  %v1250_v6 = vunpack.c.l.bf16 %v1234_v59  ;;  %v1258_v7 = vunpack.c.h.bf16 %v1234_v59 }
 0x2a7   : > { %v1233_v8 = vpack.c.bf16 %v1208_v60, %v1200_v62  ;;  %v1235_v9 = vpack.c.bf16 %v1210_v61, %v1202_v63  ;;  %v1035_v12 = vpop.f32.mrf.mxu0  ;;  %v1088_v43 = vpop.f32.mrf.mxu1  ;;  %v1215_v25 = vmax.f32 %v1032_v10, 0.0  ;;  %v1217_v26 = vmax.f32 %v1085_v11, 0.0 }
 0x2a8   : > { %v1308_v21 = vmul.f32 %v2076_v14, %v1248_v4  ;;  %v1316_v22 = vmul.f32 %v2074_v13, %v1256_v5  ;;  %v1310_v57 = vmul.f32 %v2076_v14, %v1250_v6  ;;  %v1318_v23 = vmul.f32 %v2074_v13, %v1258_v7  ;;  %v2096_v4 = vpop.permute.xlu0 %1305  ;;  %v2098_v5 = vpop.permute.xlu1 %1300 }
 0x2a9   : > { %v1249_v15 = vunpack.c.l.bf16 %v1233_v8  ;;  %v1257_v50 = vunpack.c.h.bf16 %v1233_v8  ;;  %v1251_v16 = vunpack.c.l.bf16 %v1235_v9  ;;  %v1259_v40 = vunpack.c.h.bf16 %v1235_v9  ;;  %v1037_v56 = vpop.f32.mrf.mxu0  ;;  %v1090_v20 = vpop.f32.mrf.mxu1 }
 0x2aa   : > { %v1034_v27 = vadd.f32 %v1033_v1, %v2064_v36  ;;  %v1087_v19 = vadd.f32 %v1086_v2, %v2064_v36  ;;  %v1036_v28 = vadd.f32 %v1035_v12, %v2082_v24  ;;  %v1089_v30 = vadd.f32 %v1088_v43, %v2082_v24 }
 0x2ab   : > { %v1309_v55 = vmul.f32 %v2076_v14, %v1249_v15  ;;  %v1317_v48 = vmul.f32 %v2074_v13, %v1257_v50  ;;  %v1311_v49 = vmul.f32 %v2076_v14, %v1251_v16  ;;  %v1319_v18 = vmul.f32 %v2074_v13, %v1259_v40 }
 0x2ac   : > { %v1127_v17 = vpop.f32.mrf.mxu0  ;;  %v1180_v31 = vpop.f32.mrf.mxu1  ;;  %v1038_v32 = vadd.f32 %v1037_v56, %v2082_v24  ;;  %v1091_v34 = vadd.f32 %v1090_v20, %v2082_v24  ;;  %v1340_v35 = vadd.f32 %v1316_v22, %v1308_v21  ;;  %v1358_v0 = vadd.f32 %v1318_v23, %v1310_v57 }
 0x2ad   : > { %v1223_v37 = vmax.f32 %v1036_v28, 0.0  ;;  %v1225_v38 = vmax.f32 %v1089_v30, 0.0  ;;  %v1216_v42 = vmax.f32 %v1034_v27, 0.0  ;;  %v1218_v44 = vmax.f32 %v1087_v19, 0.0 }
 0x2ae   : > { %v1129_v39 = vpop.f32.mrf.mxu0  ;;  %v1182_v41 = vpop.f32.mrf.mxu1  ;;  %v1224_v45 = vmax.f32 %v1038_v32, 0.0  ;;  %v1226_v46 = vmax.f32 %v1091_v34, 0.0  ;;  %v1349_v47 = vadd.f32 %v1317_v48, %v1309_v55  ;;  %v1128_v53 = vadd.f32 %v1127_v17, %v2058_v29 }
 0x2af   : > { %v1240_v51 = vpack.c.bf16 %v1223_v37, %v1215_v25  ;;  %v1242_v52 = vpack.c.bf16 %v1225_v38, %v1217_v26  ;;  %v1367_v58 = vadd.f32 %v1319_v18, %v1311_v49  ;;  %v1181_v61 = vadd.f32 %v1180_v31, %v2058_v29 }
 0x2b0   : > { %v1131_v54 = vpop.f32.mrf.mxu0  ;;  %v1241_v59 = vpack.c.bf16 %v1224_v45, %v1216_v42  ;;  %v1243_v60 = vpack.c.bf16 %v1226_v46, %v1218_v44  ;;  %v1184_v62 = vpop.f32.mrf.mxu1  ;;  %v1203_v43 = vmax.f32 %v1128_v53, 0.0  ;;  %v1130_v18 = vadd.f32 %v1129_v39, %v2058_v29 }
 0x2b1   : > { %v1264_v63 = vunpack.c.l.bf16 %v1240_v51  ;;  %v1272_v1 = vunpack.c.h.bf16 %v1240_v51  ;;  %v1266_v2 = vunpack.c.l.bf16 %v1242_v52  ;;  %v1274_v3 = vunpack.c.h.bf16 %v1242_v52 }
 0x2b2   : > { %v1265_v6 = vunpack.c.l.bf16 %v1241_v59  ;;  %v1273_v7 = vunpack.c.h.bf16 %v1241_v59  ;;  %v1267_v8 = vunpack.c.l.bf16 %v1243_v60  ;;  %v1275_v9 = vunpack.c.h.bf16 %v1243_v60  ;;  %v1133_v15 = vpop.f32.mrf.mxu0  ;;  %v1186_v20 = vpop.f32.mrf.mxu1 }
 0x2b3   : > { %v1324_v10 = vmul.f32 %v2098_v5, %v1264_v63  ;;  %v1332_v11 = vmul.f32 %v2096_v4, %v1272_v1  ;;  %v1326_v12 = vmul.f32 %v2098_v5, %v1266_v2  ;;  %v1334_v50 = vmul.f32 %v2096_v4, %v1274_v3 }
 0x2b4   : > { %v1325_v16 = vmul.f32 %v2098_v5, %v1265_v6  ;;  %v1333_v40 = vmul.f32 %v2096_v4, %v1273_v7  ;;  %v1327_v56 = vmul.f32 %v2098_v5, %v1267_v8  ;;  %v1132_v57 = vadd.f32 %v1131_v54, %v2062_v33  ;;  %v1137_v17 = vpop.f32.mrf.mxu0  ;;  %v1190_v32 = vpop.f32.mrf.mxu1 }
 0x2b5   : > { %v1341_v21 = vadd.f32 %v1340_v35, %v1324_v10  ;;  %v1359_v22 = vadd.f32 %v1358_v0, %v1326_v12  ;;  %v1185_v23 = vadd.f32 %v1184_v62, %v2062_v33  ;;  %v1335_v26 = vmul.f32 %v2096_v4, %v1275_v9 }
 0x2b6   : > { %v1350_v25 = vadd.f32 %v1349_v47, %v1325_v16  ;;  %v1368_v27 = vadd.f32 %v1367_v58, %v1327_v56  ;;  %v1134_v19 = vadd.f32 %v1133_v15, %v2062_v33  ;;  %v1211_v28 = vmax.f32 %v1132_v57, 0.0  ;;  %v1139_v52 = vpop.f32.mrf.mxu0  ;;  %v1192_v39 = vpop.f32.mrf.mxu1 }
 0x2b7   : > { %v1342_v55 = vadd.f32 %v1341_v21, %v1332_v11  ;;  %v1360_v48 = vadd.f32 %v1359_v22, %v1334_v50  ;;  %v1213_v30 = vmax.f32 %v1185_v23, 0.0  ;;  %v1205_v0 = vmax.f32 %v1181_v61, 0.0 }
 0x2b8   : > { %v1351_v31 = vadd.f32 %v1350_v25, %v1333_v40  ;;  %v1369_v49 = vadd.f32 %v1368_v27, %v1335_v26  ;;  %v1236_v37 = vpack.c.bf16 %v1211_v28, %v1203_v43  ;;  %v1183_v44 = vadd.f32 %v1182_v41, %v2058_v29  ;;  %v1141_v29 = vpop.f32.mrf.mxu0  ;;  %v1194_v9 = vpop.f32.mrf.mxu1 }
 0x2b9   : > { %v1343_v34 = vrot.slane %v1342_v55, 4  ;;  %v1361_v35 = vrot.slane %v1360_v48, 4  ;;  %v1187_v45 = vadd.f32 %v1186_v20, %v2062_v33  ;;  %v1238_v47 = vpack.c.bf16 %v1213_v30, %v1205_v0 }
 0x2ba   : > { %v1352_v38 = vrot.slane %v1351_v31, 4  ;;  %v1370_v42 = vrot.slane %v1369_v49, 4  ;;  %v1212_v51 = vmax.f32 %v1134_v19, 0.0  ;;  %v1252_v58 = vunpack.c.l.bf16 %v1236_v37  ;;  %v1143_v16 = vpop.f32.mrf.mxu0  ;;  %v1196_v22 = vpop.f32.mrf.mxu1 }
 0x2bb   : > { %v1344_v46 = vadd.f32 %v1343_v34, %v1342_v55  ;;  %v1362_v53 = vadd.f32 %v1361_v35, %v1360_v48  ;;  %v1260_v59 = vunpack.c.h.bf16 %v1236_v37  ;;  %v1204_v60 = vmax.f32 %v1130_v18, 0.0 }
 0x2bc   : > { %v1353_v54 = vadd.f32 %v1352_v38, %v1351_v31  ;;  %v1371_v62 = vadd.f32 %v1370_v42, %v1369_v49  ;;  %v1206_v63 = vmax.f32 %v1183_v44, 0.0  ;;  %v1214_v61 = vmax.f32 %v1187_v45, 0.0 }
 0x2bd   : > { %v1345_v1 = vrot.slane %v1344_v46, 2  ;;  %v1254_v2 = vunpack.c.l.bf16 %v1238_v47  ;;  %v1262_v3 = vunpack.c.h.bf16 %v1238_v47  ;;  %v1237_v6 = vpack.c.bf16 %v1212_v51, %v1204_v60 }
 0x2be   : > { %v1363_v41 = vrot.slane %v1362_v53, 2  ;;  %v1354_v33 = vrot.slane %v1353_v54, 2  ;;  %v1312_v7 = vmul.f32 %v2076_v14, %v1252_v58  ;;  %v1320_v8 = vmul.f32 %v2074_v13, %v1260_v59 }
 0x2bf   : > { %v1372_v10 = vrot.slane %v1371_v62, 2  ;;  %v1239_v11 = vpack.c.bf16 %v1214_v61, %v1206_v63  ;;  %v2116_v12 = vadd.f32 %v1345_v1, %v1344_v46  ;;  %v1314_v43 = vmul.f32 %v2076_v14, %v1254_v2 }
 0x2c0   : > { %v1322_v15 = vmul.f32 %v2074_v13, %v1262_v3  ;;  %v1138_v50 = vadd.f32 %v1137_v17, %v2064_v36  ;;  %v2121_v40 = vadd.f32 %v1363_v41, %v1362_v53  ;;  %v2123_v56 = vadd.f32 %v1354_v33, %v1353_v54 }
 0x2c1   : > { %v1376_v20 = vadd.f32 %v1320_v8, %v1312_v7  ;;  %v1253_v21 = vunpack.c.l.bf16 %v1237_v6  ;;  %v1261_v57 = vunpack.c.h.bf16 %v1237_v6  ;;  %v1191_v23 = vadd.f32 %v1190_v32, %v2064_v36 }
 0x2c2   : > { %v1140_v25 = vadd.f32 %v1139_v52, %v2064_v36  ;;  %v1193_v26 = vadd.f32 %v1192_v39, %v2064_v36  ;;  %v1255_v27 = vunpack.c.l.bf16 %v1239_v11  ;;  %v1142_v19 = vadd.f32 %v1141_v29, %v2082_v24 }
 0x2c3   : > { %v1195_v55 = vadd.f32 %v1194_v9, %v2082_v24  ;;  %v1144_v48 = vadd.f32 %v1143_v16, %v2082_v24  ;;  %v1263_v28 = vunpack.c.h.bf16 %v1239_v11  ;;  %v1219_v30 = vmax.f32 %v1138_v50, 0.0 }
 0x2c4   : > { %v1221_v17 = vmax.f32 %v1191_v23, 0.0  ;;  %v1197_v31 = vadd.f32 %v1196_v22, %v2082_v24  ;;  %v1220_v49 = vmax.f32 %v1140_v25, 0.0  ;;  %v1227_v18 = vmax.f32 %v1142_v19, 0.0 }
 0x2c5   : > { %v1229_v34 = vmax.f32 %v1195_v55, 0.0  ;;  %v1228_v32 = vmax.f32 %v1144_v48, 0.0  ;;  %v1373_v35 = vadd.f32 %v1372_v10, %v1371_v62  ;;  %v1394_v0 = vadd.f32 %v1322_v15, %v1314_v43 }
 0x2c6   : > { %v1222_v37 = vmax.f32 %v1193_v26, 0.0  ;;  %v1230_v36 = vmax.f32 %v1197_v31, 0.0  ;;  %v1313_v38 = vmul.f32 %v2076_v14, %v1253_v21  ;;  %v1244_v42 = vpack.c.bf16 %v1227_v18, %v1219_v30 }
 0x2c7   : > { %v1246_v44 = vpack.c.bf16 %v1229_v34, %v1221_v17  ;;  %v1245_v45 = vpack.c.bf16 %v1228_v32, %v1220_v49  ;;  %v1321_v46 = vmul.f32 %v2074_v13, %v1261_v57  ;;  %v1315_v47 = vmul.f32 %v2076_v14, %v1255_v27 }
 0x2c8   : > { %v1323_v51 = vmul.f32 %v2074_v13, %v1263_v28  ;;  %v1247_v24 = vpack.c.bf16 %v1230_v36, %v1222_v37  ;;  %v1268_v52 = vunpack.c.l.bf16 %v1244_v42  ;;  %v1276_v53 = vunpack.c.h.bf16 %v1244_v42 }
 0x2c9   : > { %v1270_v54 = vunpack.c.l.bf16 %v1246_v44  ;;  %v1278_v58 = vunpack.c.h.bf16 %v1246_v44  ;;  %v1269_v59 = vunpack.c.l.bf16 %v1245_v45  ;;  %v1277_v39 = vunpack.c.h.bf16 %v1245_v45 }
 0x2ca   : > { %v1271_v60 = vunpack.c.l.bf16 %v1247_v24  ;;  %v1279_v62 = vunpack.c.h.bf16 %v1247_v24  ;;  %v1356_v63 = vrot.slane %v2123_v56, 1  ;;  %v1374_v61 = vrot.slane %v1373_v35, 1 }
 0x2cb   : > { %v1328_v1 = vmul.f32 %v2098_v5, %v1268_v52  ;;  %v1330_v14 = vmul.f32 %v2098_v5, %v1270_v54  ;;  %v1385_v2 = vadd.f32 %v1321_v46, %v1313_v38  ;;  %v1403_v13 = vadd.f32 %v1323_v51, %v1315_v47 }
 0x2cc   : > { %v1329_v3 = vmul.f32 %v2098_v5, %v1269_v59  ;;  %v1331_v6 = vmul.f32 %v2098_v5, %v1271_v60  ;;  %v1336_v29 = vmul.f32 %v2096_v4, %v1276_v53  ;;  %v1338_v33 = vmul.f32 %v2096_v4, %v1278_v58 }
 0x2cd   : > { %v1377_v41 = vadd.f32 %v1376_v20, %v1328_v1  ;;  %v1395_v7 = vadd.f32 %v1394_v0, %v1330_v14  ;;  %v1337_v8 = vmul.f32 %v2096_v4, %v1277_v39  ;;  %v1339_v10 = vmul.f32 %v2096_v4, %v1279_v62 }
 0x2ce   : > { %v1386_v9 = vadd.f32 %v1385_v2, %v1329_v3  ;;  %v1404_v11 = vadd.f32 %v1403_v13, %v1331_v6  ;;  %v1347_v43 = vrot.slane %v2116_v12, 1  ;;  %v1365_v15 = vrot.slane %v2121_v40, 1 }
 0x2cf   : > { %v1378_v50 = vadd.f32 %v1377_v41, %v1336_v29  ;;  %v1396_v16 = vadd.f32 %v1395_v7, %v1338_v33  ;;  %v1739_v22 = vmov 1966171168   ;;  %v1436_v57 = vlaneseq }
 0x2d0   : > { %v1387_v5 = vadd.f32 %v1386_v9, %v1337_v8  ;;  %v1405_v21 = vadd.f32 %v1404_v11, %v1339_v10  ;;  %v1434_v20 = vunpack.c.l.s4 %v1739_v22  ;;  %v1357_v23 = vadd.f32 %v1356_v63, %v2123_v56 }
 0x2d1   : > { %v1375_v25 = vadd.f32 %v1374_v61, %v1373_v35  ;;  %v1379_v26 = vrot.slane %v1378_v50, 4  ;;  %v1397_v27 = vrot.slane %v1396_v16, 4  ;;  %v1412_v55 = vstv %s2136_s14 }
 0x2d2   : > { %v1388_v19 = vrot.slane %v1387_v5, 4  ;;  %v1406_v4 = vrot.slane %v1405_v21, 4  ;;  %v1348_v48 = vadd.f32 %v1347_v43, %v2116_v12  ;;  %v1366_v28 = vadd.f32 %v1365_v15, %v2121_v40 }
 0x2d3   : > { %v1380_v30 = vadd.f32 %v1379_v26, %v1378_v50  ;;  %v1398_v17 = vadd.f32 %v1397_v27, %v1396_v16  ;;  %v1435_v18 = vunpack.c.0.s8 %v1434_v20  ;;  %v1437_v34 = vshrl.u32 %v1436_v57, 7 }
 0x2d4   : > { %v1389_v31 = vadd.f32 %v1388_v19, %v1387_v5  ;;  %v1407_v49 = vadd.f32 %v1406_v4, %v1405_v21  ;;  %v1414_v37 = vadd.f32 %v1412_v55, %v1357_v23  ;;  %v1416_v56 = vadd.f32 %v1412_v55, %v1375_v25 }
 0x2d5   : > { %v1381_v32 = vrot.slane %v1380_v30, 2  ;;  %v1399_v0 = vrot.slane %v1398_v17, 2  ;;  %v1413_v44 = vadd.f32 %v1412_v55, %v1348_v48  ;;  %v1415_v45 = vadd.f32 %v1412_v55, %v1366_v28 }
 0x2d6   : > { %v1390_v35 = vrot.slane %v1389_v31, 2  ;;  %v1408_v36 = vrot.slane %v1407_v49, 2  ;;  %v1438_v40 = vsub.s32 %v1435_v18, %v1437_v34 }
 0x2d7   : > { %v1382_v38 = vadd.f32 %v1381_v32, %v1380_v30  ;;  %v1400_v42 = vadd.f32 %v1399_v0, %v1398_v17  ;;  %v1429_v24 = vcombine.low %v1413_v44, %v1414_v37  ;;  %v1430_v52 = vcombine.low %v1415_v45, %v1416_v56 }
 0x2d8   : > { %v1391_v12 = vadd.f32 %v1390_v35, %v1389_v31  ;;  %v1409_v46 = vadd.f32 %v1408_v36, %v1407_v49 }
 0x2d9   : > { %v1383_v47 = vrot.slane %v1382_v38, 1  ;;  %v1401_v51 = vrot.slane %v1400_v42, 1  ;;  %v1439_v62 = vrot.slane %v1429_v24, %v1438_v40  ;;  %v1446_v63 = vrot.slane %v1430_v52, %v1438_v40 }
 0x2da   : > { %v1392_v53 = vrot.slane %v1391_v12, 1  ;;  %v1410_v54 = vrot.slane %v1409_v46, 1 }
 0x2db   : > { %v1384_v58 = vadd.f32 %v1383_v47, %v1382_v38  ;;  %v1402_v59 = vadd.f32 %v1401_v51, %v1400_v42  ;;  %v1461_v41 = vcombine.low %v1439_v62, %v1446_v63 }
 0x2dc   : > { %v1393_v39 = vadd.f32 %v1392_v53, %v1391_v12  ;;  %v1411_v60 = vadd.f32 %v1410_v54, %v1409_v46 }
 0x2dd   : > { %v1417_v61 = vadd.f32 %v1412_v55, %v1384_v58  ;;  %v1419_v14 = vadd.f32 %v1412_v55, %v1402_v59  ;;  %v1469_v7 = vrot.slane %v1461_v41, %v1438_v40 }
 0x2de   : > { %v1418_v1 = vadd.f32 %v1412_v55, %v1393_v39  ;;  %v1420_v2 = vadd.f32 %v1412_v55, %v1411_v60 }
 0x2e0   : > { %v1431_v13 = vcombine.low %v1417_v61, %v1418_v1  ;;  %v1432_v3 = vcombine.low %v1419_v14, %v1420_v2 }
 0x2e2   : > { %v1453_v6 = vrot.slane %v1431_v13, %v1438_v40  ;;  %v1460_v29 = vrot.slane %v1432_v3, %v1438_v40 }
 0x2e4   : > { %v1462_v33 = vcombine.low %v1453_v6, %v1460_v29 }
 0x2e6   : > { %v1476_v8 = vrot.slane %v1462_v33, %v1438_v40 }
 0x2e8   : > { %v1477_v9 = vcombine.low %v1469_v7, %v1476_v8 }
 0x2ea   : > { %1479 = vst [vmem:[%s273_s18] sm:$0xff] %v1477_v9 }
 0x2eb   : > { %1689 = shalt.err (!%p1686_p3)
}
 0x2ec   : > { %s1690_s9 = scalar_lea.hbm %s1493_s22, 128  ;;  %s1694_s15 = scalar_lea.hbm %s2194_s7, 256 }
 0x2ed   : > { %p1691_p4 = scmp.ne.s32.totalorder %s1493_s22, %s1690_s9  ;;  %p1695_p9 = scmp.lt.s32.totalorder %s1493_s22, %s2194_s7 }
 0x2ee   : > { %p1696_p10 = scmp.lt.s32.totalorder %s1694_s15, %s1690_s9 }
 0x2ef   : > { %p1692_p7 = pnand %p1691_p4, %p1822_p5 }
 0x2f0   : > { %p1697_p11 = por %p1696_p10, %p1695_p9 }
 0x2f1   : > { %p1693_p8 = pneg %p1692_p7 }
 0x2f3   : > { %p1698_p12 = pnand %p1697_p11, %p1693_p8 }
 0x2f5   : > { %1701 = shalt.err (!%p1698_p12)
}
 0x2f6   : > { %1618 = dma.vmem_to_hbm [thread:$0]  (%p1822_p5), %s1496_s19, 128, %s1493_s22, %s1481_s23  }
 0x2f7 PF: > { %p1624_p13 = scmp.ge.s32.totalorder %s1736_s29, 2  ;;  %s1507_s18 = sand.u32 1, %s1724_s26  }
 0x2f8   : > { %s1508_s20 = scalar_lea.sflag [#allocation4], %s1507_s18 }
 0x2f9   : > { %p1621_p0 = pnand %p1624_p13, %p1826_p6 }
 0x2fb   : > { %p1622_p1 = pneg %p1621_p0 }
 0x2fd   : > { %1719 = dma.done.wait (%p1622_p1), %s1508_s20, 128  }
 0x2fe   : > { %1721 = vsyncadd (%p1622_p1), %s1508_s20, 4294967168  ;;  %p18_p2 = scmp.ge.s32.totalorder %s1809_s8, 4   ;;  %s2197_s26 = smov %s1728_s27 }
 0x2ff   : > { %s2198_s27 = smov %s1732_s28  ;;  %s2199_s28 = smov %s1820_s11 }
 0x300   : > { %s2200_s29 = smov %s1809_s8  ;;  %20 = sbr.rel (!%p18_p2) target bundleno = 5 (0x5), region = 85 }
 0x305   :  { %1513 = vsyncpa [#allocation4], 1 }
 0x306   :  { %1515 = vsyncpa [#allocation4 + $0x1], 1 }

</bundles_post_ra>
